<compile_context>
chip_gen: v5e
topology: v5e:2x2
jax: 0.10.0
libtpu: 0.0.40
codegen_flags: <defaults>
</compile_context>

<pallas_src>
import functools

import jax
import jax.numpy as jnp
from jax import lax
from jax.experimental import pallas as pl
from jax.experimental.pallas import tpu as pltpu

OUT_LANES = 128  # lane-dense output slab width


def fm_kernel(uids_ref, iids_ref,                       # scalar prefetch (SMEM)
              ue_hbm, ie_hbm, v_ref, w2u_ref, w2i_ref,  # inputs
              labels_ref,
              out_ref,                                  # (Bp, 128) output slab
              u_scr, i_scr, sem,                        # scratch
              *, valid_b):
    Bp, D = u_scr.shape

    # ---- gather ONLY the B needed embedding rows straight from HBM -------
    # Tables live in HBM (memory_space=pl.ANY); each needed row is a small
    # async DMA into VMEM scratch. All 2*Bp DMAs are issued up front (in
    # flight concurrently), then waited on once. Bp is small & static here.
    copies = []
    for b in range(Bp):
        cu = pltpu.make_async_copy(ue_hbm.at[pl.ds(uids_ref[b], 1), :],
                                   u_scr.at[pl.ds(b, 1), :],
                                   sem.at[b, 0])
        ci = pltpu.make_async_copy(ie_hbm.at[pl.ds(iids_ref[b], 1), :],
                                   i_scr.at[pl.ds(b, 1), :],
                                   sem.at[b, 1])
        cu.start()
        ci.start()
        copies.append(cu)
        copies.append(ci)
    for c in copies:
        c.wait()

    u = u_scr[...]                                     # (Bp, D)  user rows
    it = i_scr[...]                                    # (Bp, D)  item rows
    v = v_ref[...]                                     # (2D, F)
    vu = v[:D, :]                                      # static sublane slices
    vi = v[D:, :]                                      #   (offset D % 8 == 0)

    # ---- FM interaction ---------------------------------------------------
    # One MXU pass for x@V, split over the concat boundary (no lane concat):
    t1 = (jnp.dot(u, vu, preferred_element_type=jnp.float32)
          + jnp.dot(it, vi, preferred_element_type=jnp.float32))       # (Bp,F)
    # rowsum identity: sum_f (x^2 @ V^2)_f == x^2 . rowsum_f(V^2)
    #   -> VPU multiply + XLU lane-reduce, no second matmul.
    t2 = (jnp.sum((u * u) * w2u_ref[...], axis=1, keepdims=True)
          + jnp.sum((it * it) * w2i_ref[...], axis=1, keepdims=True))  # (Bp,1)

    pred = 0.5 * (jnp.sum(t1 * t1, axis=1, keepdims=True) - t2)        # (Bp,1)

    # NOTE(perf review): labels are a tiny (Bp,1) VMEM block -> one small DMA
    # at grid=(1,); move to SMEM scalar prefetch when B is tiled over a grid.
    labels = labels_ref[...]                                           # (Bp,1)
    diff = pred - labels
    mse = diff * diff                                  # MSELoss(reduction='none')
    if valid_b < Bp:                                   # mask padded batch rows
        row = lax.broadcasted_iota(jnp.int32, (Bp, 1), 0)
        mse_valid = jnp.where(row < valid_b, mse, 0.0)
    else:
        mse_valid = mse
    obj = jnp.sum(mse_valid, axis=0, keepdims=True)    # MSELoss(reduction='sum')

    # ---- one lane-dense (Bp, 128) slab: col0=pred, col1=mse, col2=obj -----
    lane = lax.broadcasted_iota(jnp.int32, (Bp, OUT_LANES), 1)
    slab = jnp.where(lane == 0, pred,
           jnp.where(lane == 1, mse,
           jnp.where(lane == 2, obj, 0.0)))
    out_ref[...] = slab


def fm_forward(uids, iids, labels, user_emb, item_emb, fm_V):
    B = uids.shape[0]
    D = user_emb.shape[1]
    dim, F = fm_V.shape
    assert dim == 2 * D

    # Clamp ids (DMA source indices have no runtime OOB check on TPU).
    uids_c = jnp.clip(uids.astype(jnp.int32), 0, user_emb.shape[0] - 1)
    iids_c = jnp.clip(iids.astype(jnp.int32), 0, item_emb.shape[0] - 1)

    # Pad batch up to an f32 sublane multiple (8) so the output block tiles.
    Bp = max(8, ((B + 7) // 8) * 8)
    uids_p = jnp.zeros((Bp,), jnp.int32).at[:B].set(uids_c)
    iids_p = jnp.zeros((Bp,), jnp.int32).at[:B].set(iids_c)
    labels_p = jnp.zeros((Bp, 1), jnp.float32).at[:B, 0].set(
        labels.astype(jnp.float32))

    # rowsum(V^2), split at the user/item concat boundary (computed once).
    w2 = jnp.sum(fm_V.astype(jnp.float32) * fm_V.astype(jnp.float32), axis=1)
    w2u = w2[:D].reshape(1, D)
    w2i = w2[D:].reshape(1, D)

    grid_spec = pltpu.PrefetchScalarGridSpec(
        num_scalar_prefetch=2,
        grid=(1,),
        in_specs=[
            pl.BlockSpec(memory_space=pl.ANY),                  # user table (HBM)
            pl.BlockSpec(memory_space=pl.ANY),                  # item table (HBM)
            pl.BlockSpec(fm_V.shape, lambda i, u, it: (0, 0)),  # V -> VMEM
            pl.BlockSpec((1, D), lambda i, u, it: (0, 0)),      # rowsum(V^2) user
            pl.BlockSpec((1, D), lambda i, u, it: (0, 0)),      # rowsum(V^2) item
            pl.BlockSpec((Bp, 1), lambda i, u, it: (0, 0)),     # labels
        ],
        out_specs=pl.BlockSpec((Bp, OUT_LANES), lambda i, u, it: (0, 0)),
        scratch_shapes=[
            pltpu.VMEM((Bp, D), jnp.float32),        # gathered user rows
            pltpu.VMEM((Bp, D), jnp.float32),        # gathered item rows
            pltpu.SemaphoreType.DMA((Bp, 2)),        # per-row gather sems
        ],
    )

    cost = pl.CostEstimate(
        flops=2 * Bp * dim * F + 6 * Bp * D,
        transcendentals=0,
        bytes_accessed=4 * (Bp * dim            # gathered embedding rows
                            + fm_V.size + dim   # V + rowsum(V^2)
                            + Bp                # labels
                            + Bp * OUT_LANES),  # output slab
    )

    out = pl.pallas_call(
        functools.partial(fm_kernel, valid_b=B),
        out_shape=jax.ShapeDtypeStruct((Bp, OUT_LANES), jnp.float32),
        grid_spec=grid_spec,
        compiler_params=pltpu.CompilerParams(
            dimension_semantics=("arbitrary",)),
        cost_estimate=cost,
    )(uids_p, iids_p, user_emb, item_emb, fm_V, w2u, w2i, labels_p)

    prediction = out[:B, 0]   # squeeze(1)
    mse_loss = out[:B, 1]     # MSELoss(reduction='none')
    obj_loss = out[0, 2]      # MSELoss(reduction='sum')
    return prediction, obj_loss, mse_loss


if __name__ == "__main__":
    # Small synthetic config (mirrors conf.*)
    num_users = 16
    num_items = 16
    embedding_dim = 32
    num_factors = 10
    dim = embedding_dim * 2
    B = 8

    key = jax.random.PRNGKey(0)
    k = jax.random.split(key, 8)

    # Parameter init following reset_para()
    user_embedding = jax.random.uniform(k[0], (num_users, embedding_dim),
                                        jnp.float32, -0.1, 0.1)
    item_embedding = jax.random.uniform(k[1], (num_items, embedding_dim),
                                        jnp.float32, -0.1, 0.1)
    fm_V = jax.random.uniform(k[3], (dim, num_factors), jnp.float32,
                              -0.05, 0.05)
    # fc (fm_linear_part), b_users, b_items exist in __init__ but do not
    # affect the returned (prediction, obj_loss, mse_loss) -> not materialized.

    # Example inputs
    uids = jax.random.randint(k[4], (B,), 0, num_users)
    iids = jax.random.randint(k[5], (B,), 0, num_items)
    labels = jax.random.uniform(k[6], (B,), jnp.float32, 1.0, 5.0)

    prediction, obj_loss, mse_loss = fm_forward(
        uids, iids, labels, user_embedding, item_embedding, fm_V)
    jax.block_until_ready((prediction, obj_loss, mse_loss))

    # Pure-JAX reference (mirrors the PyTorch forward)
    u_fea = jnp.take(user_embedding, uids, axis=0)
    i_fea = jnp.take(item_embedding, iids, axis=0)
    input_vec = jnp.concatenate([u_fea, i_fea], axis=1)
    t1 = jnp.square(input_vec @ fm_V)
    t2 = jnp.square(input_vec) @ jnp.square(fm_V)
    pred_ref = 0.5 * jnp.sum(t1 - t2, axis=1)
    mse_ref = jnp.square(pred_ref - labels)
    obj_ref = jnp.sum(mse_ref)

    assert jnp.allclose(prediction, pred_ref, atol=1e-5)
    assert jnp.allclose(mse_loss, mse_ref, atol=1e-5)
    assert jnp.allclose(obj_loss, obj_ref, atol=1e-5)

    print("KERNEL_OK")
</pallas_src>

<mosaic_0001>
module attributes {stable_mosaic.version = 11 : i64} {
  func.func @fm_kernel(%arg0: i32, %arg1: memref<8xi32, #tpu.memory_space<smem>>, %arg2: memref<8xi32, #tpu.memory_space<smem>>, %arg3: memref<16x32xf32, #tpu.memory_space<any>>, %arg4: memref<16x32xf32, #tpu.memory_space<any>>, %arg5: memref<64x10xf32, #tpu.memory_space<vmem>>, %arg6: memref<1x32xf32, #tpu.memory_space<vmem>>, %arg7: memref<1x32xf32, #tpu.memory_space<vmem>>, %arg8: memref<8x1xf32, #tpu.memory_space<vmem>>, %arg9: memref<8x128xf32, #tpu.memory_space<vmem>>, %arg10: memref<8x32xf32, #tpu.memory_space<vmem>>, %arg11: memref<8x32xf32, #tpu.memory_space<vmem>>, %arg12: memref<8x2x!tpu.dma_semaphore, #tpu.memory_space<semaphore_mem>>) attributes {dimension_semantics = [#tpu.dimension_semantics<arbitrary>], iteration_bounds = array<i64: 1>, scalar_prefetch = 2 : i64, scratch_operands = 3 : i64, tpu.core_type = #tpu.core_type<tc>, window_params = [{}, {}, {pipeline_mode = #tpu.pipeline_mode<synchronous>, transform_indices = @transform_2, window_bounds = array<i64: 64, 10>}, {pipeline_mode = #tpu.pipeline_mode<synchronous>, transform_indices = @transform_3, window_bounds = array<i64: 1, 32>}, {pipeline_mode = #tpu.pipeline_mode<synchronous>, transform_indices = @transform_4, window_bounds = array<i64: 1, 32>}, {pipeline_mode = #tpu.pipeline_mode<synchronous>, transform_indices = @transform_5, window_bounds = array<i64: 8, 1>}, {pipeline_mode = #tpu.pipeline_mode<synchronous>, transform_indices = @transform_6, window_bounds = array<i64: 8, 128>}]} {
    %c0 = arith.constant 0 : index
    %0 = memref.load %arg1[%c0] : memref<8xi32, #tpu.memory_space<smem>>
    %c0_0 = arith.constant 0 : index
    %1 = memref.load %arg2[%c0_0] : memref<8xi32, #tpu.memory_space<smem>>
    %c0_i32 = arith.constant 0 : i32
    %c0_i32_1 = arith.constant 0 : i32
    %c0_i32_2 = arith.constant 0 : i32
    %2 = tpu.memref_slice %arg3[%0, %c0_i32_2] : memref<16x32xf32, #tpu.memory_space<any>> -> memref<1x32xf32, #tpu.memory_space<any>>
    %c0_i32_3 = arith.constant 0 : i32
    %c0_i32_4 = arith.constant 0 : i32
    %3 = tpu.memref_slice %arg10[%c0_i32_3, %c0_i32_4] : memref<8x32xf32, #tpu.memory_space<vmem>> -> memref<1x32xf32, #tpu.memory_space<vmem>>
    %4 = tpu.memref_slice %arg12[%c0_i32, %c0_i32_1] : memref<8x2x!tpu.dma_semaphore, #tpu.memory_space<semaphore_mem>> -> memref<1x1x!tpu.dma_semaphore, #tpu.memory_space<semaphore_mem>>
    %5 = tpu.memref_squeeze %4 : memref<1x1x!tpu.dma_semaphore, #tpu.memory_space<semaphore_mem>> -> memref<!tpu.dma_semaphore, #tpu.memory_space<semaphore_mem>>
    tpu.enqueue_dma source(%2 : memref<1x32xf32, #tpu.memory_space<any>>) target(%3 : memref<1x32xf32, #tpu.memory_space<vmem>>) target_semaphore(%5 : memref<!tpu.dma_semaphore, #tpu.memory_space<semaphore_mem>>)
    %c0_i32_5 = arith.constant 0 : i32
    %c1_i32 = arith.constant 1 : i32
    %c0_i32_6 = arith.constant 0 : i32
    %6 = tpu.memref_slice %arg4[%1, %c0_i32_6] : memref<16x32xf32, #tpu.memory_space<any>> -> memref<1x32xf32, #tpu.memory_space<any>>
    %c0_i32_7 = arith.constant 0 : i32
    %c0_i32_8 = arith.constant 0 : i32
    %7 = tpu.memref_slice %arg11[%c0_i32_7, %c0_i32_8] : memref<8x32xf32, #tpu.memory_space<vmem>> -> memref<1x32xf32, #tpu.memory_space<vmem>>
    %8 = tpu.memref_slice %arg12[%c0_i32_5, %c1_i32] : memref<8x2x!tpu.dma_semaphore, #tpu.memory_space<semaphore_mem>> -> memref<1x1x!tpu.dma_semaphore, #tpu.memory_space<semaphore_mem>>
    %9 = tpu.memref_squeeze %8 : memref<1x1x!tpu.dma_semaphore, #tpu.memory_space<semaphore_mem>> -> memref<!tpu.dma_semaphore, #tpu.memory_space<semaphore_mem>>
    tpu.enqueue_dma source(%6 : memref<1x32xf32, #tpu.memory_space<any>>) target(%7 : memref<1x32xf32, #tpu.memory_space<vmem>>) target_semaphore(%9 : memref<!tpu.dma_semaphore, #tpu.memory_space<semaphore_mem>>)
    %c1 = arith.constant 1 : index
    %10 = memref.load %arg1[%c1] : memref<8xi32, #tpu.memory_space<smem>>
    %c1_9 = arith.constant 1 : index
    %11 = memref.load %arg2[%c1_9] : memref<8xi32, #tpu.memory_space<smem>>
    %c1_i32_10 = arith.constant 1 : i32
    %c0_i32_11 = arith.constant 0 : i32
    %c0_i32_12 = arith.constant 0 : i32
    %12 = tpu.memref_slice %arg3[%10, %c0_i32_12] : memref<16x32xf32, #tpu.memory_space<any>> -> memref<1x32xf32, #tpu.memory_space<any>>
    %c1_i32_13 = arith.constant 1 : i32
    %c0_i32_14 = arith.constant 0 : i32
    %13 = tpu.memref_slice %arg10[%c1_i32_13, %c0_i32_14] : memref<8x32xf32, #tpu.memory_space<vmem>> -> memref<1x32xf32, #tpu.memory_space<vmem>>
    %14 = tpu.memref_slice %arg12[%c1_i32_10, %c0_i32_11] : memref<8x2x!tpu.dma_semaphore, #tpu.memory_space<semaphore_mem>> -> memref<1x1x!tpu.dma_semaphore, #tpu.memory_space<semaphore_mem>>
    %15 = tpu.memref_squeeze %14 : memref<1x1x!tpu.dma_semaphore, #tpu.memory_space<semaphore_mem>> -> memref<!tpu.dma_semaphore, #tpu.memory_space<semaphore_mem>>
    tpu.enqueue_dma source(%12 : memref<1x32xf32, #tpu.memory_space<any>>) target(%13 : memref<1x32xf32, #tpu.memory_space<vmem>>) target_semaphore(%15 : memref<!tpu.dma_semaphore, #tpu.memory_space<semaphore_mem>>)
    %c1_i32_15 = arith.constant 1 : i32
    %c1_i32_16 = arith.constant 1 : i32
    %c0_i32_17 = arith.constant 0 : i32
    %16 = tpu.memref_slice %arg4[%11, %c0_i32_17] : memref<16x32xf32, #tpu.memory_space<any>> -> memref<1x32xf32, #tpu.memory_space<any>>
    %c1_i32_18 = arith.constant 1 : i32
    %c0_i32_19 = arith.constant 0 : i32
    %17 = tpu.memref_slice %arg11[%c1_i32_18, %c0_i32_19] : memref<8x32xf32, #tpu.memory_space<vmem>> -> memref<1x32xf32, #tpu.memory_space<vmem>>
    %18 = tpu.memref_slice %arg12[%c1_i32_15, %c1_i32_16] : memref<8x2x!tpu.dma_semaphore, #tpu.memory_space<semaphore_mem>> -> memref<1x1x!tpu.dma_semaphore, #tpu.memory_space<semaphore_mem>>
    %19 = tpu.memref_squeeze %18 : memref<1x1x!tpu.dma_semaphore, #tpu.memory_space<semaphore_mem>> -> memref<!tpu.dma_semaphore, #tpu.memory_space<semaphore_mem>>
    tpu.enqueue_dma source(%16 : memref<1x32xf32, #tpu.memory_space<any>>) target(%17 : memref<1x32xf32, #tpu.memory_space<vmem>>) target_semaphore(%19 : memref<!tpu.dma_semaphore, #tpu.memory_space<semaphore_mem>>)
    %c2 = arith.constant 2 : index
    %20 = memref.load %arg1[%c2] : memref<8xi32, #tpu.memory_space<smem>>
    %c2_20 = arith.constant 2 : index
    %21 = memref.load %arg2[%c2_20] : memref<8xi32, #tpu.memory_space<smem>>
    %c2_i32 = arith.constant 2 : i32
    %c0_i32_21 = arith.constant 0 : i32
    %c0_i32_22 = arith.constant 0 : i32
    %22 = tpu.memref_slice %arg3[%20, %c0_i32_22] : memref<16x32xf32, #tpu.memory_space<any>> -> memref<1x32xf32, #tpu.memory_space<any>>
    %c2_i32_23 = arith.constant 2 : i32
    %c0_i32_24 = arith.constant 0 : i32
    %23 = tpu.memref_slice %arg10[%c2_i32_23, %c0_i32_24] : memref<8x32xf32, #tpu.memory_space<vmem>> -> memref<1x32xf32, #tpu.memory_space<vmem>>
    %24 = tpu.memref_slice %arg12[%c2_i32, %c0_i32_21] : memref<8x2x!tpu.dma_semaphore, #tpu.memory_space<semaphore_mem>> -> memref<1x1x!tpu.dma_semaphore, #tpu.memory_space<semaphore_mem>>
    %25 = tpu.memref_squeeze %24 : memref<1x1x!tpu.dma_semaphore, #tpu.memory_space<semaphore_mem>> -> memref<!tpu.dma_semaphore, #tpu.memory_space<semaphore_mem>>
    tpu.enqueue_dma source(%22 : memref<1x32xf32, #tpu.memory_space<any>>) target(%23 : memref<1x32xf32, #tpu.memory_space<vmem>>) target_semaphore(%25 : memref<!tpu.dma_semaphore, #tpu.memory_space<semaphore_mem>>)
    %c2_i32_25 = arith.constant 2 : i32
    %c1_i32_26 = arith.constant 1 : i32
    %c0_i32_27 = arith.constant 0 : i32
    %26 = tpu.memref_slice %arg4[%21, %c0_i32_27] : memref<16x32xf32, #tpu.memory_space<any>> -> memref<1x32xf32, #tpu.memory_space<any>>
    %c2_i32_28 = arith.constant 2 : i32
    %c0_i32_29 = arith.constant 0 : i32
    %27 = tpu.memref_slice %arg11[%c2_i32_28, %c0_i32_29] : memref<8x32xf32, #tpu.memory_space<vmem>> -> memref<1x32xf32, #tpu.memory_space<vmem>>
    %28 = tpu.memref_slice %arg12[%c2_i32_25, %c1_i32_26] : memref<8x2x!tpu.dma_semaphore, #tpu.memory_space<semaphore_mem>> -> memref<1x1x!tpu.dma_semaphore, #tpu.memory_space<semaphore_mem>>
    %29 = tpu.memref_squeeze %28 : memref<1x1x!tpu.dma_semaphore, #tpu.memory_space<semaphore_mem>> -> memref<!tpu.dma_semaphore, #tpu.memory_space<semaphore_mem>>
    tpu.enqueue_dma source(%26 : memref<1x32xf32, #tpu.memory_space<any>>) target(%27 : memref<1x32xf32, #tpu.memory_space<vmem>>) target_semaphore(%29 : memref<!tpu.dma_semaphore, #tpu.memory_space<semaphore_mem>>)
    %c3 = arith.constant 3 : index
    %30 = memref.load %arg1[%c3] : memref<8xi32, #tpu.memory_space<smem>>
    %c3_30 = arith.constant 3 : index
    %31 = memref.load %arg2[%c3_30] : memref<8xi32, #tpu.memory_space<smem>>
    %c3_i32 = arith.constant 3 : i32
    %c0_i32_31 = arith.constant 0 : i32
    %c0_i32_32 = arith.constant 0 : i32
    %32 = tpu.memref_slice %arg3[%30, %c0_i32_32] : memref<16x32xf32, #tpu.memory_space<any>> -> memref<1x32xf32, #tpu.memory_space<any>>
    %c3_i32_33 = arith.constant 3 : i32
    %c0_i32_34 = arith.constant 0 : i32
    %33 = tpu.memref_slice %arg10[%c3_i32_33, %c0_i32_34] : memref<8x32xf32, #tpu.memory_space<vmem>> -> memref<1x32xf32, #tpu.memory_space<vmem>>
    %34 = tpu.memref_slice %arg12[%c3_i32, %c0_i32_31] : memref<8x2x!tpu.dma_semaphore, #tpu.memory_space<semaphore_mem>> -> memref<1x1x!tpu.dma_semaphore, #tpu.memory_space<semaphore_mem>>
    %35 = tpu.memref_squeeze %34 : memref<1x1x!tpu.dma_semaphore, #tpu.memory_space<semaphore_mem>> -> memref<!tpu.dma_semaphore, #tpu.memory_space<semaphore_mem>>
    tpu.enqueue_dma source(%32 : memref<1x32xf32, #tpu.memory_space<any>>) target(%33 : memref<1x32xf32, #tpu.memory_space<vmem>>) target_semaphore(%35 : memref<!tpu.dma_semaphore, #tpu.memory_space<semaphore_mem>>)
    %c3_i32_35 = arith.constant 3 : i32
    %c1_i32_36 = arith.constant 1 : i32
    %c0_i32_37 = arith.constant 0 : i32
    %36 = tpu.memref_slice %arg4[%31, %c0_i32_37] : memref<16x32xf32, #tpu.memory_space<any>> -> memref<1x32xf32, #tpu.memory_space<any>>
    %c3_i32_38 = arith.constant 3 : i32
    %c0_i32_39 = arith.constant 0 : i32
    %37 = tpu.memref_slice %arg11[%c3_i32_38, %c0_i32_39] : memref<8x32xf32, #tpu.memory_space<vmem>> -> memref<1x32xf32, #tpu.memory_space<vmem>>
    %38 = tpu.memref_slice %arg12[%c3_i32_35, %c1_i32_36] : memref<8x2x!tpu.dma_semaphore, #tpu.memory_space<semaphore_mem>> -> memref<1x1x!tpu.dma_semaphore, #tpu.memory_space<semaphore_mem>>
    %39 = tpu.memref_squeeze %38 : memref<1x1x!tpu.dma_semaphore, #tpu.memory_space<semaphore_mem>> -> memref<!tpu.dma_semaphore, #tpu.memory_space<semaphore_mem>>
    tpu.enqueue_dma source(%36 : memref<1x32xf32, #tpu.memory_space<any>>) target(%37 : memref<1x32xf32, #tpu.memory_space<vmem>>) target_semaphore(%39 : memref<!tpu.dma_semaphore, #tpu.memory_space<semaphore_mem>>)
    %c4 = arith.constant 4 : index
    %40 = memref.load %arg1[%c4] : memref<8xi32, #tpu.memory_space<smem>>
    %c4_40 = arith.constant 4 : index
    %41 = memref.load %arg2[%c4_40] : memref<8xi32, #tpu.memory_space<smem>>
    %c4_i32 = arith.constant 4 : i32
    %c0_i32_41 = arith.constant 0 : i32
    %c0_i32_42 = arith.constant 0 : i32
    %42 = tpu.memref_slice %arg3[%40, %c0_i32_42] : memref<16x32xf32, #tpu.memory_space<any>> -> memref<1x32xf32, #tpu.memory_space<any>>
    %c4_i32_43 = arith.constant 4 : i32
    %c0_i32_44 = arith.constant 0 : i32
    %43 = tpu.memref_slice %arg10[%c4_i32_43, %c0_i32_44] : memref<8x32xf32, #tpu.memory_space<vmem>> -> memref<1x32xf32, #tpu.memory_space<vmem>>
    %44 = tpu.memref_slice %arg12[%c4_i32, %c0_i32_41] : memref<8x2x!tpu.dma_semaphore, #tpu.memory_space<semaphore_mem>> -> memref<1x1x!tpu.dma_semaphore, #tpu.memory_space<semaphore_mem>>
    %45 = tpu.memref_squeeze %44 : memref<1x1x!tpu.dma_semaphore, #tpu.memory_space<semaphore_mem>> -> memref<!tpu.dma_semaphore, #tpu.memory_space<semaphore_mem>>
    tpu.enqueue_dma source(%42 : memref<1x32xf32, #tpu.memory_space<any>>) target(%43 : memref<1x32xf32, #tpu.memory_space<vmem>>) target_semaphore(%45 : memref<!tpu.dma_semaphore, #tpu.memory_space<semaphore_mem>>)
    %c4_i32_45 = arith.constant 4 : i32
    %c1_i32_46 = arith.constant 1 : i32
    %c0_i32_47 = arith.constant 0 : i32
    %46 = tpu.memref_slice %arg4[%41, %c0_i32_47] : memref<16x32xf32, #tpu.memory_space<any>> -> memref<1x32xf32, #tpu.memory_space<any>>
    %c4_i32_48 = arith.constant 4 : i32
    %c0_i32_49 = arith.constant 0 : i32
    %47 = tpu.memref_slice %arg11[%c4_i32_48, %c0_i32_49] : memref<8x32xf32, #tpu.memory_space<vmem>> -> memref<1x32xf32, #tpu.memory_space<vmem>>
    %48 = tpu.memref_slice %arg12[%c4_i32_45, %c1_i32_46] : memref<8x2x!tpu.dma_semaphore, #tpu.memory_space<semaphore_mem>> -> memref<1x1x!tpu.dma_semaphore, #tpu.memory_space<semaphore_mem>>
    %49 = tpu.memref_squeeze %48 : memref<1x1x!tpu.dma_semaphore, #tpu.memory_space<semaphore_mem>> -> memref<!tpu.dma_semaphore, #tpu.memory_space<semaphore_mem>>
    tpu.enqueue_dma source(%46 : memref<1x32xf32, #tpu.memory_space<any>>) target(%47 : memref<1x32xf32, #tpu.memory_space<vmem>>) target_semaphore(%49 : memref<!tpu.dma_semaphore, #tpu.memory_space<semaphore_mem>>)
    %c5 = arith.constant 5 : index
    %50 = memref.load %arg1[%c5] : memref<8xi32, #tpu.memory_space<smem>>
    %c5_50 = arith.constant 5 : index
    %51 = memref.load %arg2[%c5_50] : memref<8xi32, #tpu.memory_space<smem>>
    %c5_i32 = arith.constant 5 : i32
    %c0_i32_51 = arith.constant 0 : i32
    %c0_i32_52 = arith.constant 0 : i32
    %52 = tpu.memref_slice %arg3[%50, %c0_i32_52] : memref<16x32xf32, #tpu.memory_space<any>> -> memref<1x32xf32, #tpu.memory_space<any>>
    %c5_i32_53 = arith.constant 5 : i32
    %c0_i32_54 = arith.constant 0 : i32
    %53 = tpu.memref_slice %arg10[%c5_i32_53, %c0_i32_54] : memref<8x32xf32, #tpu.memory_space<vmem>> -> memref<1x32xf32, #tpu.memory_space<vmem>>
    %54 = tpu.memref_slice %arg12[%c5_i32, %c0_i32_51] : memref<8x2x!tpu.dma_semaphore, #tpu.memory_space<semaphore_mem>> -> memref<1x1x!tpu.dma_semaphore, #tpu.memory_space<semaphore_mem>>
    %55 = tpu.memref_squeeze %54 : memref<1x1x!tpu.dma_semaphore, #tpu.memory_space<semaphore_mem>> -> memref<!tpu.dma_semaphore, #tpu.memory_space<semaphore_mem>>
    tpu.enqueue_dma source(%52 : memref<1x32xf32, #tpu.memory_space<any>>) target(%53 : memref<1x32xf32, #tpu.memory_space<vmem>>) target_semaphore(%55 : memref<!tpu.dma_semaphore, #tpu.memory_space<semaphore_mem>>)
    %c5_i32_55 = arith.constant 5 : i32
    %c1_i32_56 = arith.constant 1 : i32
    %c0_i32_57 = arith.constant 0 : i32
    %56 = tpu.memref_slice %arg4[%51, %c0_i32_57] : memref<16x32xf32, #tpu.memory_space<any>> -> memref<1x32xf32, #tpu.memory_space<any>>
    %c5_i32_58 = arith.constant 5 : i32
    %c0_i32_59 = arith.constant 0 : i32
    %57 = tpu.memref_slice %arg11[%c5_i32_58, %c0_i32_59] : memref<8x32xf32, #tpu.memory_space<vmem>> -> memref<1x32xf32, #tpu.memory_space<vmem>>
    %58 = tpu.memref_slice %arg12[%c5_i32_55, %c1_i32_56] : memref<8x2x!tpu.dma_semaphore, #tpu.memory_space<semaphore_mem>> -> memref<1x1x!tpu.dma_semaphore, #tpu.memory_space<semaphore_mem>>
    %59 = tpu.memref_squeeze %58 : memref<1x1x!tpu.dma_semaphore, #tpu.memory_space<semaphore_mem>> -> memref<!tpu.dma_semaphore, #tpu.memory_space<semaphore_mem>>
    tpu.enqueue_dma source(%56 : memref<1x32xf32, #tpu.memory_space<any>>) target(%57 : memref<1x32xf32, #tpu.memory_space<vmem>>) target_semaphore(%59 : memref<!tpu.dma_semaphore, #tpu.memory_space<semaphore_mem>>)
    %c6 = arith.constant 6 : index
    %60 = memref.load %arg1[%c6] : memref<8xi32, #tpu.memory_space<smem>>
    %c6_60 = arith.constant 6 : index
    %61 = memref.load %arg2[%c6_60] : memref<8xi32, #tpu.memory_space<smem>>
    %c6_i32 = arith.constant 6 : i32
    %c0_i32_61 = arith.constant 0 : i32
    %c0_i32_62 = arith.constant 0 : i32
    %62 = tpu.memref_slice %arg3[%60, %c0_i32_62] : memref<16x32xf32, #tpu.memory_space<any>> -> memref<1x32xf32, #tpu.memory_space<any>>
    %c6_i32_63 = arith.constant 6 : i32
    %c0_i32_64 = arith.constant 0 : i32
    %63 = tpu.memref_slice %arg10[%c6_i32_63, %c0_i32_64] : memref<8x32xf32, #tpu.memory_space<vmem>> -> memref<1x32xf32, #tpu.memory_space<vmem>>
    %64 = tpu.memref_slice %arg12[%c6_i32, %c0_i32_61] : memref<8x2x!tpu.dma_semaphore, #tpu.memory_space<semaphore_mem>> -> memref<1x1x!tpu.dma_semaphore, #tpu.memory_space<semaphore_mem>>
    %65 = tpu.memref_squeeze %64 : memref<1x1x!tpu.dma_semaphore, #tpu.memory_space<semaphore_mem>> -> memref<!tpu.dma_semaphore, #tpu.memory_space<semaphore_mem>>
    tpu.enqueue_dma source(%62 : memref<1x32xf32, #tpu.memory_space<any>>) target(%63 : memref<1x32xf32, #tpu.memory_space<vmem>>) target_semaphore(%65 : memref<!tpu.dma_semaphore, #tpu.memory_space<semaphore_mem>>)
    %c6_i32_65 = arith.constant 6 : i32
    %c1_i32_66 = arith.constant 1 : i32
    %c0_i32_67 = arith.constant 0 : i32
    %66 = tpu.memref_slice %arg4[%61, %c0_i32_67] : memref<16x32xf32, #tpu.memory_space<any>> -> memref<1x32xf32, #tpu.memory_space<any>>
    %c6_i32_68 = arith.constant 6 : i32
    %c0_i32_69 = arith.constant 0 : i32
    %67 = tpu.memref_slice %arg11[%c6_i32_68, %c0_i32_69] : memref<8x32xf32, #tpu.memory_space<vmem>> -> memref<1x32xf32, #tpu.memory_space<vmem>>
    %68 = tpu.memref_slice %arg12[%c6_i32_65, %c1_i32_66] : memref<8x2x!tpu.dma_semaphore, #tpu.memory_space<semaphore_mem>> -> memref<1x1x!tpu.dma_semaphore, #tpu.memory_space<semaphore_mem>>
    %69 = tpu.memref_squeeze %68 : memref<1x1x!tpu.dma_semaphore, #tpu.memory_space<semaphore_mem>> -> memref<!tpu.dma_semaphore, #tpu.memory_space<semaphore_mem>>
    tpu.enqueue_dma source(%66 : memref<1x32xf32, #tpu.memory_space<any>>) target(%67 : memref<1x32xf32, #tpu.memory_space<vmem>>) target_semaphore(%69 : memref<!tpu.dma_semaphore, #tpu.memory_space<semaphore_mem>>)
    %c7 = arith.constant 7 : index
    %70 = memref.load %arg1[%c7] : memref<8xi32, #tpu.memory_space<smem>>
    %c7_70 = arith.constant 7 : index
    %71 = memref.load %arg2[%c7_70] : memref<8xi32, #tpu.memory_space<smem>>
    %c7_i32 = arith.constant 7 : i32
    %c0_i32_71 = arith.constant 0 : i32
    %c0_i32_72 = arith.constant 0 : i32
    %72 = tpu.memref_slice %arg3[%70, %c0_i32_72] : memref<16x32xf32, #tpu.memory_space<any>> -> memref<1x32xf32, #tpu.memory_space<any>>
    %c7_i32_73 = arith.constant 7 : i32
    %c0_i32_74 = arith.constant 0 : i32
    %73 = tpu.memref_slice %arg10[%c7_i32_73, %c0_i32_74] : memref<8x32xf32, #tpu.memory_space<vmem>> -> memref<1x32xf32, #tpu.memory_space<vmem>>
    %74 = tpu.memref_slice %arg12[%c7_i32, %c0_i32_71] : memref<8x2x!tpu.dma_semaphore, #tpu.memory_space<semaphore_mem>> -> memref<1x1x!tpu.dma_semaphore, #tpu.memory_space<semaphore_mem>>
    %75 = tpu.memref_squeeze %74 : memref<1x1x!tpu.dma_semaphore, #tpu.memory_space<semaphore_mem>> -> memref<!tpu.dma_semaphore, #tpu.memory_space<semaphore_mem>>
    tpu.enqueue_dma source(%72 : memref<1x32xf32, #tpu.memory_space<any>>) target(%73 : memref<1x32xf32, #tpu.memory_space<vmem>>) target_semaphore(%75 : memref<!tpu.dma_semaphore, #tpu.memory_space<semaphore_mem>>)
    %c7_i32_75 = arith.constant 7 : i32
    %c1_i32_76 = arith.constant 1 : i32
    %c0_i32_77 = arith.constant 0 : i32
    %76 = tpu.memref_slice %arg4[%71, %c0_i32_77] : memref<16x32xf32, #tpu.memory_space<any>> -> memref<1x32xf32, #tpu.memory_space<any>>
    %c7_i32_78 = arith.constant 7 : i32
    %c0_i32_79 = arith.constant 0 : i32
    %77 = tpu.memref_slice %arg11[%c7_i32_78, %c0_i32_79] : memref<8x32xf32, #tpu.memory_space<vmem>> -> memref<1x32xf32, #tpu.memory_space<vmem>>
    %78 = tpu.memref_slice %arg12[%c7_i32_75, %c1_i32_76] : memref<8x2x!tpu.dma_semaphore, #tpu.memory_space<semaphore_mem>> -> memref<1x1x!tpu.dma_semaphore, #tpu.memory_space<semaphore_mem>>
    %79 = tpu.memref_squeeze %78 : memref<1x1x!tpu.dma_semaphore, #tpu.memory_space<semaphore_mem>> -> memref<!tpu.dma_semaphore, #tpu.memory_space<semaphore_mem>>
    tpu.enqueue_dma source(%76 : memref<1x32xf32, #tpu.memory_space<any>>) target(%77 : memref<1x32xf32, #tpu.memory_space<vmem>>) target_semaphore(%79 : memref<!tpu.dma_semaphore, #tpu.memory_space<semaphore_mem>>)
    %c0_i32_80 = arith.constant 0 : i32
    %c0_i32_81 = arith.constant 0 : i32
    %c0_i32_82 = arith.constant 0 : i32
    %80 = tpu.memref_slice %arg3[%0, %c0_i32_82] : memref<16x32xf32, #tpu.memory_space<any>> -> memref<1x32xf32, #tpu.memory_space<any>>
    %c0_i32_83 = arith.constant 0 : i32
    %c0_i32_84 = arith.constant 0 : i32
    %81 = tpu.memref_slice %arg10[%c0_i32_83, %c0_i32_84] : memref<8x32xf32, #tpu.memory_space<vmem>> -> memref<1x32xf32, #tpu.memory_space<vmem>>
    %82 = tpu.memref_slice %arg12[%c0_i32_80, %c0_i32_81] : memref<8x2x!tpu.dma_semaphore, #tpu.memory_space<semaphore_mem>> -> memref<1x1x!tpu.dma_semaphore, #tpu.memory_space<semaphore_mem>>
    %83 = tpu.memref_squeeze %82 : memref<1x1x!tpu.dma_semaphore, #tpu.memory_space<semaphore_mem>> -> memref<!tpu.dma_semaphore, #tpu.memory_space<semaphore_mem>>
    tpu.wait_dma2 semaphore(%83 : memref<!tpu.dma_semaphore, #tpu.memory_space<semaphore_mem>>) src(%80 : memref<1x32xf32, #tpu.memory_space<any>>) dst(%81 : memref<1x32xf32, #tpu.memory_space<vmem>>)
    %c0_i32_85 = arith.constant 0 : i32
    %c1_i32_86 = arith.constant 1 : i32
    %c0_i32_87 = arith.constant 0 : i32
    %84 = tpu.memref_slice %arg4[%1, %c0_i32_87] : memref<16x32xf32, #tpu.memory_space<any>> -> memref<1x32xf32, #tpu.memory_space<any>>
    %c0_i32_88 = arith.constant 0 : i32
    %c0_i32_89 = arith.constant 0 : i32
    %85 = tpu.memref_slice %arg11[%c0_i32_88, %c0_i32_89] : memref<8x32xf32, #tpu.memory_space<vmem>> -> memref<1x32xf32, #tpu.memory_space<vmem>>
    %86 = tpu.memref_slice %arg12[%c0_i32_85, %c1_i32_86] : memref<8x2x!tpu.dma_semaphore, #tpu.memory_space<semaphore_mem>> -> memref<1x1x!tpu.dma_semaphore, #tpu.memory_space<semaphore_mem>>
    %87 = tpu.memref_squeeze %86 : memref<1x1x!tpu.dma_semaphore, #tpu.memory_space<semaphore_mem>> -> memref<!tpu.dma_semaphore, #tpu.memory_space<semaphore_mem>>
    tpu.wait_dma2 semaphore(%87 : memref<!tpu.dma_semaphore, #tpu.memory_space<semaphore_mem>>) src(%84 : memref<1x32xf32, #tpu.memory_space<any>>) dst(%85 : memref<1x32xf32, #tpu.memory_space<vmem>>)
    %c1_i32_90 = arith.constant 1 : i32
    %c0_i32_91 = arith.constant 0 : i32
    %c0_i32_92 = arith.constant 0 : i32
    %88 = tpu.memref_slice %arg3[%10, %c0_i32_92] : memref<16x32xf32, #tpu.memory_space<any>> -> memref<1x32xf32, #tpu.memory_space<any>>
    %c1_i32_93 = arith.constant 1 : i32
    %c0_i32_94 = arith.constant 0 : i32
    %89 = tpu.memref_slice %arg10[%c1_i32_93, %c0_i32_94] : memref<8x32xf32, #tpu.memory_space<vmem>> -> memref<1x32xf32, #tpu.memory_space<vmem>>
    %90 = tpu.memref_slice %arg12[%c1_i32_90, %c0_i32_91] : memref<8x2x!tpu.dma_semaphore, #tpu.memory_space<semaphore_mem>> -> memref<1x1x!tpu.dma_semaphore, #tpu.memory_space<semaphore_mem>>
    %91 = tpu.memref_squeeze %90 : memref<1x1x!tpu.dma_semaphore, #tpu.memory_space<semaphore_mem>> -> memref<!tpu.dma_semaphore, #tpu.memory_space<semaphore_mem>>
    tpu.wait_dma2 semaphore(%91 : memref<!tpu.dma_semaphore, #tpu.memory_space<semaphore_mem>>) src(%88 : memref<1x32xf32, #tpu.memory_space<any>>) dst(%89 : memref<1x32xf32, #tpu.memory_space<vmem>>)
    %c1_i32_95 = arith.constant 1 : i32
    %c1_i32_96 = arith.constant 1 : i32
    %c0_i32_97 = arith.constant 0 : i32
    %92 = tpu.memref_slice %arg4[%11, %c0_i32_97] : memref<16x32xf32, #tpu.memory_space<any>> -> memref<1x32xf32, #tpu.memory_space<any>>
    %c1_i32_98 = arith.constant 1 : i32
    %c0_i32_99 = arith.constant 0 : i32
    %93 = tpu.memref_slice %arg11[%c1_i32_98, %c0_i32_99] : memref<8x32xf32, #tpu.memory_space<vmem>> -> memref<1x32xf32, #tpu.memory_space<vmem>>
    %94 = tpu.memref_slice %arg12[%c1_i32_95, %c1_i32_96] : memref<8x2x!tpu.dma_semaphore, #tpu.memory_space<semaphore_mem>> -> memref<1x1x!tpu.dma_semaphore, #tpu.memory_space<semaphore_mem>>
    %95 = tpu.memref_squeeze %94 : memref<1x1x!tpu.dma_semaphore, #tpu.memory_space<semaphore_mem>> -> memref<!tpu.dma_semaphore, #tpu.memory_space<semaphore_mem>>
    tpu.wait_dma2 semaphore(%95 : memref<!tpu.dma_semaphore, #tpu.memory_space<semaphore_mem>>) src(%92 : memref<1x32xf32, #tpu.memory_space<any>>) dst(%93 : memref<1x32xf32, #tpu.memory_space<vmem>>)
    %c2_i32_100 = arith.constant 2 : i32
    %c0_i32_101 = arith.constant 0 : i32
    %c0_i32_102 = arith.constant 0 : i32
    %96 = tpu.memref_slice %arg3[%20, %c0_i32_102] : memref<16x32xf32, #tpu.memory_space<any>> -> memref<1x32xf32, #tpu.memory_space<any>>
    %c2_i32_103 = arith.constant 2 : i32
    %c0_i32_104 = arith.constant 0 : i32
    %97 = tpu.memref_slice %arg10[%c2_i32_103, %c0_i32_104] : memref<8x32xf32, #tpu.memory_space<vmem>> -> memref<1x32xf32, #tpu.memory_space<vmem>>
    %98 = tpu.memref_slice %arg12[%c2_i32_100, %c0_i32_101] : memref<8x2x!tpu.dma_semaphore, #tpu.memory_space<semaphore_mem>> -> memref<1x1x!tpu.dma_semaphore, #tpu.memory_space<semaphore_mem>>
    %99 = tpu.memref_squeeze %98 : memref<1x1x!tpu.dma_semaphore, #tpu.memory_space<semaphore_mem>> -> memref<!tpu.dma_semaphore, #tpu.memory_space<semaphore_mem>>
    tpu.wait_dma2 semaphore(%99 : memref<!tpu.dma_semaphore, #tpu.memory_space<semaphore_mem>>) src(%96 : memref<1x32xf32, #tpu.memory_space<any>>) dst(%97 : memref<1x32xf32, #tpu.memory_space<vmem>>)
    %c2_i32_105 = arith.constant 2 : i32
    %c1_i32_106 = arith.constant 1 : i32
    %c0_i32_107 = arith.constant 0 : i32
    %100 = tpu.memref_slice %arg4[%21, %c0_i32_107] : memref<16x32xf32, #tpu.memory_space<any>> -> memref<1x32xf32, #tpu.memory_space<any>>
    %c2_i32_108 = arith.constant 2 : i32
    %c0_i32_109 = arith.constant 0 : i32
    %101 = tpu.memref_slice %arg11[%c2_i32_108, %c0_i32_109] : memref<8x32xf32, #tpu.memory_space<vmem>> -> memref<1x32xf32, #tpu.memory_space<vmem>>
    %102 = tpu.memref_slice %arg12[%c2_i32_105, %c1_i32_106] : memref<8x2x!tpu.dma_semaphore, #tpu.memory_space<semaphore_mem>> -> memref<1x1x!tpu.dma_semaphore, #tpu.memory_space<semaphore_mem>>
    %103 = tpu.memref_squeeze %102 : memref<1x1x!tpu.dma_semaphore, #tpu.memory_space<semaphore_mem>> -> memref<!tpu.dma_semaphore, #tpu.memory_space<semaphore_mem>>
    tpu.wait_dma2 semaphore(%103 : memref<!tpu.dma_semaphore, #tpu.memory_space<semaphore_mem>>) src(%100 : memref<1x32xf32, #tpu.memory_space<any>>) dst(%101 : memref<1x32xf32, #tpu.memory_space<vmem>>)
    %c3_i32_110 = arith.constant 3 : i32
    %c0_i32_111 = arith.constant 0 : i32
    %c0_i32_112 = arith.constant 0 : i32
    %104 = tpu.memref_slice %arg3[%30, %c0_i32_112] : memref<16x32xf32, #tpu.memory_space<any>> -> memref<1x32xf32, #tpu.memory_space<any>>
    %c3_i32_113 = arith.constant 3 : i32
    %c0_i32_114 = arith.constant 0 : i32
    %105 = tpu.memref_slice %arg10[%c3_i32_113, %c0_i32_114] : memref<8x32xf32, #tpu.memory_space<vmem>> -> memref<1x32xf32, #tpu.memory_space<vmem>>
    %106 = tpu.memref_slice %arg12[%c3_i32_110, %c0_i32_111] : memref<8x2x!tpu.dma_semaphore, #tpu.memory_space<semaphore_mem>> -> memref<1x1x!tpu.dma_semaphore, #tpu.memory_space<semaphore_mem>>
    %107 = tpu.memref_squeeze %106 : memref<1x1x!tpu.dma_semaphore, #tpu.memory_space<semaphore_mem>> -> memref<!tpu.dma_semaphore, #tpu.memory_space<semaphore_mem>>
    tpu.wait_dma2 semaphore(%107 : memref<!tpu.dma_semaphore, #tpu.memory_space<semaphore_mem>>) src(%104 : memref<1x32xf32, #tpu.memory_space<any>>) dst(%105 : memref<1x32xf32, #tpu.memory_space<vmem>>)
    %c3_i32_115 = arith.constant 3 : i32
    %c1_i32_116 = arith.constant 1 : i32
    %c0_i32_117 = arith.constant 0 : i32
    %108 = tpu.memref_slice %arg4[%31, %c0_i32_117] : memref<16x32xf32, #tpu.memory_space<any>> -> memref<1x32xf32, #tpu.memory_space<any>>
    %c3_i32_118 = arith.constant 3 : i32
    %c0_i32_119 = arith.constant 0 : i32
    %109 = tpu.memref_slice %arg11[%c3_i32_118, %c0_i32_119] : memref<8x32xf32, #tpu.memory_space<vmem>> -> memref<1x32xf32, #tpu.memory_space<vmem>>
    %110 = tpu.memref_slice %arg12[%c3_i32_115, %c1_i32_116] : memref<8x2x!tpu.dma_semaphore, #tpu.memory_space<semaphore_mem>> -> memref<1x1x!tpu.dma_semaphore, #tpu.memory_space<semaphore_mem>>
    %111 = tpu.memref_squeeze %110 : memref<1x1x!tpu.dma_semaphore, #tpu.memory_space<semaphore_mem>> -> memref<!tpu.dma_semaphore, #tpu.memory_space<semaphore_mem>>
    tpu.wait_dma2 semaphore(%111 : memref<!tpu.dma_semaphore, #tpu.memory_space<semaphore_mem>>) src(%108 : memref<1x32xf32, #tpu.memory_space<any>>) dst(%109 : memref<1x32xf32, #tpu.memory_space<vmem>>)
    %c4_i32_120 = arith.constant 4 : i32
    %c0_i32_121 = arith.constant 0 : i32
    %c0_i32_122 = arith.constant 0 : i32
    %112 = tpu.memref_slice %arg3[%40, %c0_i32_122] : memref<16x32xf32, #tpu.memory_space<any>> -> memref<1x32xf32, #tpu.memory_space<any>>
    %c4_i32_123 = arith.constant 4 : i32
    %c0_i32_124 = arith.constant 0 : i32
    %113 = tpu.memref_slice %arg10[%c4_i32_123, %c0_i32_124] : memref<8x32xf32, #tpu.memory_space<vmem>> -> memref<1x32xf32, #tpu.memory_space<vmem>>
    %114 = tpu.memref_slice %arg12[%c4_i32_120, %c0_i32_121] : memref<8x2x!tpu.dma_semaphore, #tpu.memory_space<semaphore_mem>> -> memref<1x1x!tpu.dma_semaphore, #tpu.memory_space<semaphore_mem>>
    %115 = tpu.memref_squeeze %114 : memref<1x1x!tpu.dma_semaphore, #tpu.memory_space<semaphore_mem>> -> memref<!tpu.dma_semaphore, #tpu.memory_space<semaphore_mem>>
    tpu.wait_dma2 semaphore(%115 : memref<!tpu.dma_semaphore, #tpu.memory_space<semaphore_mem>>) src(%112 : memref<1x32xf32, #tpu.memory_space<any>>) dst(%113 : memref<1x32xf32, #tpu.memory_space<vmem>>)
    %c4_i32_125 = arith.constant 4 : i32
    %c1_i32_126 = arith.constant 1 : i32
    %c0_i32_127 = arith.constant 0 : i32
    %116 = tpu.memref_slice %arg4[%41, %c0_i32_127] : memref<16x32xf32, #tpu.memory_space<any>> -> memref<1x32xf32, #tpu.memory_space<any>>
    %c4_i32_128 = arith.constant 4 : i32
    %c0_i32_129 = arith.constant 0 : i32
    %117 = tpu.memref_slice %arg11[%c4_i32_128, %c0_i32_129] : memref<8x32xf32, #tpu.memory_space<vmem>> -> memref<1x32xf32, #tpu.memory_space<vmem>>
    %118 = tpu.memref_slice %arg12[%c4_i32_125, %c1_i32_126] : memref<8x2x!tpu.dma_semaphore, #tpu.memory_space<semaphore_mem>> -> memref<1x1x!tpu.dma_semaphore, #tpu.memory_space<semaphore_mem>>
    %119 = tpu.memref_squeeze %118 : memref<1x1x!tpu.dma_semaphore, #tpu.memory_space<semaphore_mem>> -> memref<!tpu.dma_semaphore, #tpu.memory_space<semaphore_mem>>
    tpu.wait_dma2 semaphore(%119 : memref<!tpu.dma_semaphore, #tpu.memory_space<semaphore_mem>>) src(%116 : memref<1x32xf32, #tpu.memory_space<any>>) dst(%117 : memref<1x32xf32, #tpu.memory_space<vmem>>)
    %c5_i32_130 = arith.constant 5 : i32
    %c0_i32_131 = arith.constant 0 : i32
    %c0_i32_132 = arith.constant 0 : i32
    %120 = tpu.memref_slice %arg3[%50, %c0_i32_132] : memref<16x32xf32, #tpu.memory_space<any>> -> memref<1x32xf32, #tpu.memory_space<any>>
    %c5_i32_133 = arith.constant 5 : i32
    %c0_i32_134 = arith.constant 0 : i32
    %121 = tpu.memref_slice %arg10[%c5_i32_133, %c0_i32_134] : memref<8x32xf32, #tpu.memory_space<vmem>> -> memref<1x32xf32, #tpu.memory_space<vmem>>
    %122 = tpu.memref_slice %arg12[%c5_i32_130, %c0_i32_131] : memref<8x2x!tpu.dma_semaphore, #tpu.memory_space<semaphore_mem>> -> memref<1x1x!tpu.dma_semaphore, #tpu.memory_space<semaphore_mem>>
    %123 = tpu.memref_squeeze %122 : memref<1x1x!tpu.dma_semaphore, #tpu.memory_space<semaphore_mem>> -> memref<!tpu.dma_semaphore, #tpu.memory_space<semaphore_mem>>
    tpu.wait_dma2 semaphore(%123 : memref<!tpu.dma_semaphore, #tpu.memory_space<semaphore_mem>>) src(%120 : memref<1x32xf32, #tpu.memory_space<any>>) dst(%121 : memref<1x32xf32, #tpu.memory_space<vmem>>)
    %c5_i32_135 = arith.constant 5 : i32
    %c1_i32_136 = arith.constant 1 : i32
    %c0_i32_137 = arith.constant 0 : i32
    %124 = tpu.memref_slice %arg4[%51, %c0_i32_137] : memref<16x32xf32, #tpu.memory_space<any>> -> memref<1x32xf32, #tpu.memory_space<any>>
    %c5_i32_138 = arith.constant 5 : i32
    %c0_i32_139 = arith.constant 0 : i32
    %125 = tpu.memref_slice %arg11[%c5_i32_138, %c0_i32_139] : memref<8x32xf32, #tpu.memory_space<vmem>> -> memref<1x32xf32, #tpu.memory_space<vmem>>
    %126 = tpu.memref_slice %arg12[%c5_i32_135, %c1_i32_136] : memref<8x2x!tpu.dma_semaphore, #tpu.memory_space<semaphore_mem>> -> memref<1x1x!tpu.dma_semaphore, #tpu.memory_space<semaphore_mem>>
    %127 = tpu.memref_squeeze %126 : memref<1x1x!tpu.dma_semaphore, #tpu.memory_space<semaphore_mem>> -> memref<!tpu.dma_semaphore, #tpu.memory_space<semaphore_mem>>
    tpu.wait_dma2 semaphore(%127 : memref<!tpu.dma_semaphore, #tpu.memory_space<semaphore_mem>>) src(%124 : memref<1x32xf32, #tpu.memory_space<any>>) dst(%125 : memref<1x32xf32, #tpu.memory_space<vmem>>)
    %c6_i32_140 = arith.constant 6 : i32
    %c0_i32_141 = arith.constant 0 : i32
    %c0_i32_142 = arith.constant 0 : i32
    %128 = tpu.memref_slice %arg3[%60, %c0_i32_142] : memref<16x32xf32, #tpu.memory_space<any>> -> memref<1x32xf32, #tpu.memory_space<any>>
    %c6_i32_143 = arith.constant 6 : i32
    %c0_i32_144 = arith.constant 0 : i32
    %129 = tpu.memref_slice %arg10[%c6_i32_143, %c0_i32_144] : memref<8x32xf32, #tpu.memory_space<vmem>> -> memref<1x32xf32, #tpu.memory_space<vmem>>
    %130 = tpu.memref_slice %arg12[%c6_i32_140, %c0_i32_141] : memref<8x2x!tpu.dma_semaphore, #tpu.memory_space<semaphore_mem>> -> memref<1x1x!tpu.dma_semaphore, #tpu.memory_space<semaphore_mem>>
    %131 = tpu.memref_squeeze %130 : memref<1x1x!tpu.dma_semaphore, #tpu.memory_space<semaphore_mem>> -> memref<!tpu.dma_semaphore, #tpu.memory_space<semaphore_mem>>
    tpu.wait_dma2 semaphore(%131 : memref<!tpu.dma_semaphore, #tpu.memory_space<semaphore_mem>>) src(%128 : memref<1x32xf32, #tpu.memory_space<any>>) dst(%129 : memref<1x32xf32, #tpu.memory_space<vmem>>)
    %c6_i32_145 = arith.constant 6 : i32
    %c1_i32_146 = arith.constant 1 : i32
    %c0_i32_147 = arith.constant 0 : i32
    %132 = tpu.memref_slice %arg4[%61, %c0_i32_147] : memref<16x32xf32, #tpu.memory_space<any>> -> memref<1x32xf32, #tpu.memory_space<any>>
    %c6_i32_148 = arith.constant 6 : i32
    %c0_i32_149 = arith.constant 0 : i32
    %133 = tpu.memref_slice %arg11[%c6_i32_148, %c0_i32_149] : memref<8x32xf32, #tpu.memory_space<vmem>> -> memref<1x32xf32, #tpu.memory_space<vmem>>
    %134 = tpu.memref_slice %arg12[%c6_i32_145, %c1_i32_146] : memref<8x2x!tpu.dma_semaphore, #tpu.memory_space<semaphore_mem>> -> memref<1x1x!tpu.dma_semaphore, #tpu.memory_space<semaphore_mem>>
    %135 = tpu.memref_squeeze %134 : memref<1x1x!tpu.dma_semaphore, #tpu.memory_space<semaphore_mem>> -> memref<!tpu.dma_semaphore, #tpu.memory_space<semaphore_mem>>
    tpu.wait_dma2 semaphore(%135 : memref<!tpu.dma_semaphore, #tpu.memory_space<semaphore_mem>>) src(%132 : memref<1x32xf32, #tpu.memory_space<any>>) dst(%133 : memref<1x32xf32, #tpu.memory_space<vmem>>)
    %c7_i32_150 = arith.constant 7 : i32
    %c0_i32_151 = arith.constant 0 : i32
    %c0_i32_152 = arith.constant 0 : i32
    %136 = tpu.memref_slice %arg3[%70, %c0_i32_152] : memref<16x32xf32, #tpu.memory_space<any>> -> memref<1x32xf32, #tpu.memory_space<any>>
    %c7_i32_153 = arith.constant 7 : i32
    %c0_i32_154 = arith.constant 0 : i32
    %137 = tpu.memref_slice %arg10[%c7_i32_153, %c0_i32_154] : memref<8x32xf32, #tpu.memory_space<vmem>> -> memref<1x32xf32, #tpu.memory_space<vmem>>
    %138 = tpu.memref_slice %arg12[%c7_i32_150, %c0_i32_151] : memref<8x2x!tpu.dma_semaphore, #tpu.memory_space<semaphore_mem>> -> memref<1x1x!tpu.dma_semaphore, #tpu.memory_space<semaphore_mem>>
    %139 = tpu.memref_squeeze %138 : memref<1x1x!tpu.dma_semaphore, #tpu.memory_space<semaphore_mem>> -> memref<!tpu.dma_semaphore, #tpu.memory_space<semaphore_mem>>
    tpu.wait_dma2 semaphore(%139 : memref<!tpu.dma_semaphore, #tpu.memory_space<semaphore_mem>>) src(%136 : memref<1x32xf32, #tpu.memory_space<any>>) dst(%137 : memref<1x32xf32, #tpu.memory_space<vmem>>)
    %c7_i32_155 = arith.constant 7 : i32
    %c1_i32_156 = arith.constant 1 : i32
    %c0_i32_157 = arith.constant 0 : i32
    %140 = tpu.memref_slice %arg4[%71, %c0_i32_157] : memref<16x32xf32, #tpu.memory_space<any>> -> memref<1x32xf32, #tpu.memory_space<any>>
    %c7_i32_158 = arith.constant 7 : i32
    %c0_i32_159 = arith.constant 0 : i32
    %141 = tpu.memref_slice %arg11[%c7_i32_158, %c0_i32_159] : memref<8x32xf32, #tpu.memory_space<vmem>> -> memref<1x32xf32, #tpu.memory_space<vmem>>
    %142 = tpu.memref_slice %arg12[%c7_i32_155, %c1_i32_156] : memref<8x2x!tpu.dma_semaphore, #tpu.memory_space<semaphore_mem>> -> memref<1x1x!tpu.dma_semaphore, #tpu.memory_space<semaphore_mem>>
    %143 = tpu.memref_squeeze %142 : memref<1x1x!tpu.dma_semaphore, #tpu.memory_space<semaphore_mem>> -> memref<!tpu.dma_semaphore, #tpu.memory_space<semaphore_mem>>
    tpu.wait_dma2 semaphore(%143 : memref<!tpu.dma_semaphore, #tpu.memory_space<semaphore_mem>>) src(%140 : memref<1x32xf32, #tpu.memory_space<any>>) dst(%141 : memref<1x32xf32, #tpu.memory_space<vmem>>)
    %c0_160 = arith.constant 0 : index
    %c0_161 = arith.constant 0 : index
    %144 = vector.load %arg10[%c0_160, %c0_161] : memref<8x32xf32, #tpu.memory_space<vmem>>, vector<8x32xf32>
    %c0_162 = arith.constant 0 : index
    %c0_163 = arith.constant 0 : index
    %145 = vector.load %arg11[%c0_162, %c0_163] : memref<8x32xf32, #tpu.memory_space<vmem>>, vector<8x32xf32>
    %c0_164 = arith.constant 0 : index
    %c0_165 = arith.constant 0 : index
    %146 = vector.load %arg5[%c0_164, %c0_165] : memref<64x10xf32, #tpu.memory_space<vmem>>, vector<64x10xf32>
    %147 = vector.extract_strided_slice %146 {offsets = [0, 0], sizes = [32, 10], strides = [1, 1]} : vector<64x10xf32> to vector<32x10xf32>
    %148 = vector.extract_strided_slice %146 {offsets = [32, 0], sizes = [32, 10], strides = [1, 1]} : vector<64x10xf32> to vector<32x10xf32>
    %cst = arith.constant dense<0.000000e+00> : vector<8x10xf32>
    %149 = tpu.matmul %144, %147, %cst {dimension_numbers = #tpu.dot_dimension_numbers<[1], [0], [0], [1], [0, 0, 1, 1], [], []>} : vector<8x32xf32>, vector<32x10xf32>, vector<8x10xf32> -> vector<8x10xf32>
    %cst_166 = arith.constant dense<0.000000e+00> : vector<8x10xf32>
    %150 = tpu.matmul %145, %148, %cst_166 {dimension_numbers = #tpu.dot_dimension_numbers<[1], [0], [0], [1], [0, 0, 1, 1], [], []>} : vector<8x32xf32>, vector<32x10xf32>, vector<8x10xf32> -> vector<8x10xf32>
    %151 = arith.addf %149, %150 : vector<8x10xf32>
    %152 = arith.mulf %144, %144 : vector<8x32xf32>
    %c0_167 = arith.constant 0 : index
    %c0_168 = arith.constant 0 : index
    %153 = vector.load %arg6[%c0_167, %c0_168] : memref<1x32xf32, #tpu.memory_space<vmem>>, vector<1x32xf32>
    %154 = vector.broadcast %153 : vector<1x32xf32> to vector<8x32xf32>
    %155 = arith.mulf %152, %154 : vector<8x32xf32>
    %cst_169 = arith.constant dense<0.000000e+00> : vector<8xf32>
    %156 = vector.multi_reduction <add>, %155, %cst_169 [1] : vector<8x32xf32> to vector<8xf32>
    %157 = vector.shape_cast %156 : vector<8xf32> to vector<8x1xf32>
    %158 = arith.mulf %145, %145 : vector<8x32xf32>
    %c0_170 = arith.constant 0 : index
    %c0_171 = arith.constant 0 : index
    %159 = vector.load %arg7[%c0_170, %c0_171] : memref<1x32xf32, #tpu.memory_space<vmem>>, vector<1x32xf32>
    %160 = vector.broadcast %159 : vector<1x32xf32> to vector<8x32xf32>
    %161 = arith.mulf %158, %160 : vector<8x32xf32>
    %cst_172 = arith.constant dense<0.000000e+00> : vector<8xf32>
    %162 = vector.multi_reduction <add>, %161, %cst_172 [1] : vector<8x32xf32> to vector<8xf32>
    %163 = vector.shape_cast %162 : vector<8xf32> to vector<8x1xf32>
    %164 = arith.addf %157, %163 : vector<8x1xf32>
    %165 = arith.mulf %151, %151 : vector<8x10xf32>
    %cst_173 = arith.constant dense<0.000000e+00> : vector<8xf32>
    %166 = vector.multi_reduction <add>, %165, %cst_173 [1] : vector<8x10xf32> to vector<8xf32>
    %167 = vector.shape_cast %166 : vector<8xf32> to vector<8x1xf32>
    %168 = arith.subf %167, %164 : vector<8x1xf32>
    %cst_174 = arith.constant 5.000000e-01 : f32
    %169 = vector.broadcast %cst_174 : f32 to vector<8x1xf32>
    %170 = arith.mulf %169, %168 : vector<8x1xf32>
    %c0_175 = arith.constant 0 : index
    %c0_176 = arith.constant 0 : index
    %171 = vector.load %arg8[%c0_175, %c0_176] : memref<8x1xf32, #tpu.memory_space<vmem>>, vector<8x1xf32>
    %172 = arith.subf %170, %171 : vector<8x1xf32>
    %173 = arith.mulf %172, %172 : vector<8x1xf32>
    %cst_177 = arith.constant dense<0.000000e+00> : vector<1xf32>
    %174 = vector.multi_reduction <add>, %173, %cst_177 [0] : vector<8x1xf32> to vector<1xf32>
    %175 = vector.shape_cast %174 : vector<1xf32> to vector<1x1xf32>
    %176 = tpu.iota {dimensions = array<i32: 1>} : vector<8x128xi32>
    %c0_i32_178 = arith.constant 0 : i32
    %177 = vector.broadcast %c0_i32_178 : i32 to vector<8x128xi32>
    %178 = arith.cmpi eq, %176, %177 : vector<8x128xi32>
    %c1_i32_179 = arith.constant 1 : i32
    %179 = vector.broadcast %c1_i32_179 : i32 to vector<8x128xi32>
    %180 = arith.cmpi eq, %176, %179 : vector<8x128xi32>
    %c2_i32_180 = arith.constant 2 : i32
    %181 = vector.broadcast %c2_i32_180 : i32 to vector<8x128xi32>
    %182 = arith.cmpi eq, %176, %181 : vector<8x128xi32>
    %cst_181 = arith.constant 0.000000e+00 : f32
    %183 = vector.shape_cast %175 : vector<1x1xf32> to vector<1x1xf32>
    %184 = vector.broadcast %183 : vector<1x1xf32> to vector<8x128xf32>
    %185 = vector.broadcast %cst_181 : f32 to vector<8x128xf32>
    %186 = arith.select %182, %184, %185 : vector<8x128xi1>, vector<8x128xf32>
    %187 = vector.shape_cast %173 : vector<8x1xf32> to vector<8x1xf32>
    %188 = vector.broadcast %187 : vector<8x1xf32> to vector<8x128xf32>
    %189 = arith.select %180, %188, %186 : vector<8x128xi1>, vector<8x128xf32>
    %190 = vector.shape_cast %170 : vector<8x1xf32> to vector<8x1xf32>
    %191 = vector.broadcast %190 : vector<8x1xf32> to vector<8x128xf32>
    %192 = arith.select %178, %191, %189 : vector<8x128xi1>, vector<8x128xf32>
    %c0_182 = arith.constant 0 : index
    %c0_183 = arith.constant 0 : index
    %193 = vector.load %arg9[%c0_182, %c0_183] : memref<8x128xf32, #tpu.memory_space<vmem>>, vector<8x128xf32>
    tpu.vector_store %arg9[%c0_182, %c0_183], %192 {strides = array<i32>} : memref<8x128xf32, #tpu.memory_space<vmem>>, vector<8x128xf32>,
    return
  }
  func.func @transform_2(%arg0: i32, %arg1: memref<8xi32, #tpu.memory_space<smem>>, %arg2: memref<8xi32, #tpu.memory_space<smem>>) -> (i32, i32) {
    %c0_i32 = arith.constant 0 : i32
    %c0_i32_0 = arith.constant 0 : i32
    %c0_i32_1 = arith.constant 0 : i32
    return %c0_i32, %c0_i32_0 : i32, i32
  }
  func.func @transform_3(%arg0: i32, %arg1: memref<8xi32, #tpu.memory_space<smem>>, %arg2: memref<8xi32, #tpu.memory_space<smem>>) -> (i32, i32) {
    %c0_i32 = arith.constant 0 : i32
    %c0_i32_0 = arith.constant 0 : i32
    %c0_i32_1 = arith.constant 0 : i32
    return %c0_i32, %c0_i32_0 : i32, i32
  }
  func.func @transform_4(%arg0: i32, %arg1: memref<8xi32, #tpu.memory_space<smem>>, %arg2: memref<8xi32, #tpu.memory_space<smem>>) -> (i32, i32) {
    %c0_i32 = arith.constant 0 : i32
    %c0_i32_0 = arith.constant 0 : i32
    %c0_i32_1 = arith.constant 0 : i32
    return %c0_i32, %c0_i32_0 : i32, i32
  }
  func.func @transform_5(%arg0: i32, %arg1: memref<8xi32, #tpu.memory_space<smem>>, %arg2: memref<8xi32, #tpu.memory_space<smem>>) -> (i32, i32) {
    %c0_i32 = arith.constant 0 : i32
    %c0_i32_0 = arith.constant 0 : i32
    %c0_i32_1 = arith.constant 0 : i32
    return %c0_i32, %c0_i32_0 : i32, i32
  }
  func.func @transform_6(%arg0: i32, %arg1: memref<8xi32, #tpu.memory_space<smem>>, %arg2: memref<8xi32, #tpu.memory_space<smem>>) -> (i32, i32) {
    %c0_i32 = arith.constant 0 : i32
    %c0_i32_0 = arith.constant 0 : i32
    %c0_i32_1 = arith.constant 0 : i32
    return %c0_i32, %c0_i32_0 : i32, i32
  }
}

</mosaic_0001>

<bundles_post_ra>
// kernel: tpu_custom_call.1
= control target key start
LH: loop header
LB: loop body
LE: loop exit
PB: predicated region body
PF: predicated region fallthrough
CT: control target
= control target key end

     0   :  { %s1118_s11 = smov [#allocation6]   ;;  %s1119_s12 = smov [#allocation7]   ;;  %s1257_s0 = inlined_call_operand.vmem [shape: s32[8], index: 0, kind: input, shape index: {}]   ;;  %s1258_s2 = inlined_call_operand.vmem [shape: f32[16,32], index: 2, kind: input, shape index: {}]   ;;  %s1259_s3 = inlined_call_operand.vmem [shape: f32[16,32], index: 3, kind: input, shape index: {}]   ;;  %s1260_s4 = inlined_call_operand.vmem [shape: f32[64,10], index: 4, kind: input, shape index: {}]   ;;  %s1261_s5 = inlined_call_operand.vmem [shape: f32[1,32], index: 5, kind: input, shape index: {}]   ;;  %s1262_s6 = inlined_call_operand.vmem [shape: f32[1,32], index: 6, kind: input, shape index: {}]   ;;  %s1263_s7 = inlined_call_operand.vmem [shape: f32[8,1], index: 7, kind: input, shape index: {}]   ;;  %s1264_s8 = inlined_call_operand.hbm [shape: f32[8,128], index: 8, kind: output, shape index: {}]   ;;  %s1265_s1 = inlined_call_operand.vmem [shape: s32[8], index: 1, kind: input, shape index: {}]  }
   0x1   :  { %s14_s29 = sshll.u32 %s1257_s0, 4  ;;  %s19_s10 = sshll.u32 %s1265_s1, 4  ;;  %s15_s29 = int_to_ptr.vmem [resolvable:$true] %s14_s29  ;;  %s20_s10 = int_to_ptr.vmem [resolvable:$true] %s19_s10 }
   0x2   :  { %17 = dma.vmem_to_smem %s15_s29, 16, %s1118_s11, [#allocation5] }
   0x3   :  { %22 = dma.vmem_to_smem %s20_s10, 16, %s1119_s12, [#allocation5] }
   0x4   :  { %1082 = dma.done.wait [#allocation5], 32 }
   0x5   :  { %1083 = vsyncadd [#allocation5], 4294967264 }
   0x6   :  { %25 = sfence }
   0x7   :  { %26 = vsyncpa [#allocation9], 0  ;;  %s35_s13 = sld [smem:[#allocation6]] }
   0x8   :  { %s36_s14 = sld [smem:[#allocation7]] }
   0xd   :  { %s37_s0 = scalar_lea.vmem %s1258_s2, %s35_s13 }
   0xe   :  { %v52_v0 = vld [vmem:[%s37_s0] sm:$0x1] }
   0xf   :  { %53 = vst [vmem:[#allocation2] sm:$0x1] %v52_v0 }
  0x10   :  { %71 = vsyncadd [#allocation4], 16  ;;  %s72_s18 = scalar_lea.vmem %s1259_s3, %s36_s14 }
  0x11   :  { %v88_v1 = vld [vmem:[%s72_s18] sm:$0x1] }
  0x12   :  { %89 = vst [vmem:[#allocation3] sm:$0x1] %v88_v1 }
  0x13   :  { %107 = vsyncadd [#allocation4 + $0x1], 16  ;;  %s993_s19 = sld [smem:[#allocation6 + $0x1]] }
  0x14   :  { %s994_s20 = sld [smem:[#allocation7 + $0x1]] }
  0x19   :  { %s110_s23 = scalar_lea.vmem %s1258_s2, %s993_s19 }
  0x1a   :  { %v127_v2 = vld [vmem:[%s110_s23] sm:$0x1] }
  0x1b   :  { %128 = vst [vmem:[#allocation2 + $0x1] sm:$0x1] %v127_v2 }
  0x1c   :  { %146 = vsyncadd [#allocation4 + $0x2], 16  ;;  %s147_s26 = scalar_lea.vmem %s1259_s3, %s994_s20 }
  0x1d   :  { %v164_v3 = vld [vmem:[%s147_s26] sm:$0x1] }
  0x1e   :  { %165 = vst [vmem:[#allocation3 + $0x1] sm:$0x1] %v164_v3 }
  0x1f   :  { %183 = vsyncadd [#allocation4 + $0x3], 16  ;;  %s995_s27 = sld [smem:[#allocation6 + $0x2]] }
  0x20   :  { %s996_s28 = sld [smem:[#allocation7 + $0x2]] }
  0x25   :  { %s186_s9 = scalar_lea.vmem %s1258_s2, %s995_s27 }
  0x26   :  { %v203_v4 = vld [vmem:[%s186_s9] sm:$0x1] }
  0x27   :  { %204 = vst [vmem:[#allocation2 + $0x2] sm:$0x1] %v203_v4 }
  0x28   :  { %222 = vsyncadd [#allocation4 + $0x4], 16  ;;  %s223_s12 = scalar_lea.vmem %s1259_s3, %s996_s28 }
  0x29   :  { %v240_v5 = vld [vmem:[%s223_s12] sm:$0x1] }
  0x2a   :  { %241 = vst [vmem:[#allocation3 + $0x2] sm:$0x1] %v240_v5 }
  0x2b   :  { %259 = vsyncadd [#allocation4 + $0x5], 16  ;;  %s997_s13 = sld [smem:[#allocation6 + $0x3]] }
  0x2c   :  { %s998_s14 = sld [smem:[#allocation7 + $0x3]] }
  0x31   :  { %s262_s0 = scalar_lea.vmem %s1258_s2, %s997_s13 }
  0x32   :  { %v279_v6 = vld [vmem:[%s262_s0] sm:$0x1] }
  0x33   :  { %280 = vst [vmem:[#allocation2 + $0x3] sm:$0x1] %v279_v6 }
  0x34   :  { %298 = vsyncadd [#allocation4 + $0x6], 16  ;;  %s299_s18 = scalar_lea.vmem %s1259_s3, %s998_s14 }
  0x35   :  { %v316_v7 = vld [vmem:[%s299_s18] sm:$0x1] }
  0x36   :  { %317 = vst [vmem:[#allocation3 + $0x3] sm:$0x1] %v316_v7 }
  0x37   :  { %335 = vsyncadd [#allocation4 + $0x7], 16  ;;  %s999_s19 = sld [smem:[#allocation6 + $0x4]] }
  0x38   :  { %s1000_s20 = sld [smem:[#allocation7 + $0x4]] }
  0x3d   :  { %s338_s23 = scalar_lea.vmem %s1258_s2, %s999_s19 }
  0x3e   :  { %v355_v8 = vld [vmem:[%s338_s23] sm:$0x1] }
  0x3f   :  { %356 = vst [vmem:[#allocation2 + $0x4] sm:$0x1] %v355_v8 }
  0x40   :  { %374 = vsyncadd [#allocation4 + $0x8], 16  ;;  %s375_s26 = scalar_lea.vmem %s1259_s3, %s1000_s20 }
  0x41   :  { %v392_v9 = vld [vmem:[%s375_s26] sm:$0x1] }
  0x42   :  { %393 = vst [vmem:[#allocation3 + $0x4] sm:$0x1] %v392_v9 }
  0x43   :  { %411 = vsyncadd [#allocation4 + $0x9], 16  ;;  %s1001_s27 = sld [smem:[#allocation6 + $0x5]] }
  0x44   :  { %s1002_s28 = sld [smem:[#allocation7 + $0x5]] }
  0x49   :  { %s414_s9 = scalar_lea.vmem %s1258_s2, %s1001_s27 }
  0x4a   :  { %v431_v10 = vld [vmem:[%s414_s9] sm:$0x1] }
  0x4b   :  { %432 = vst [vmem:[#allocation2 + $0x5] sm:$0x1] %v431_v10 }
  0x4c   :  { %450 = vsyncadd [#allocation4 + $0xa], 16  ;;  %s451_s12 = scalar_lea.vmem %s1259_s3, %s1002_s28 }
  0x4d   :  { %v468_v11 = vld [vmem:[%s451_s12] sm:$0x1] }
  0x4e   :  { %469 = vst [vmem:[#allocation3 + $0x5] sm:$0x1] %v468_v11 }
  0x4f   :  { %487 = vsyncadd [#allocation4 + $0xb], 16  ;;  %s1003_s13 = sld [smem:[#allocation6 + $0x6]] }
  0x50   :  { %s1004_s14 = sld [smem:[#allocation7 + $0x6]] }
  0x55   :  { %s490_s0 = scalar_lea.vmem %s1258_s2, %s1003_s13 }
  0x56   :  { %v507_v12 = vld [vmem:[%s490_s0] sm:$0x1] }
  0x57   :  { %508 = vst [vmem:[#allocation2 + $0x6] sm:$0x1] %v507_v12 }
  0x58   :  { %526 = vsyncadd [#allocation4 + $0xc], 16  ;;  %s527_s18 = scalar_lea.vmem %s1259_s3, %s1004_s14 }
  0x59   :  { %v544_v13 = vld [vmem:[%s527_s18] sm:$0x1] }
  0x5a   :  { %545 = vst [vmem:[#allocation3 + $0x6] sm:$0x1] %v544_v13 }
  0x5b   :  { %563 = vsyncadd [#allocation4 + $0xd], 16  ;;  %s1005_s19 = sld [smem:[#allocation6 + $0x7]] }
  0x5c   :  { %s1006_s20 = sld [smem:[#allocation7 + $0x7]] }
  0x61   :  { %s566_s23 = scalar_lea.vmem %s1258_s2, %s1005_s19 }
  0x62   :  { %v583_v14 = vld [vmem:[%s566_s23] sm:$0x1] }
  0x63   :  { %584 = vst [vmem:[#allocation2 + $0x7] sm:$0x1] %v583_v14 }
  0x64   :  { %602 = vsyncadd [#allocation4 + $0xe], 16  ;;  %s603_s26 = scalar_lea.vmem %s1259_s3, %s1006_s20 }
  0x65   :  { %v620_v15 = vld [vmem:[%s603_s26] sm:$0x1] }
  0x66   :  { %621 = vst [vmem:[#allocation3 + $0x7] sm:$0x1] %v620_v15 }
  0x67   :  { %639 = vsyncadd [#allocation4 + $0xf], 16 }
  0x68   :  { %1084 = dma.done.wait [#allocation4], 16 }
  0x69   :  { %1085 = vsyncadd [#allocation4], 4294967280 }
  0x6a   :  { %1086 = dma.done.wait [#allocation4 + $0x1], 16 }
  0x6b   :  { %1087 = vsyncadd [#allocation4 + $0x1], 4294967280 }
  0x6c   :  { %1088 = dma.done.wait [#allocation4 + $0x2], 16 }
  0x6d   :  { %1089 = vsyncadd [#allocation4 + $0x2], 4294967280 }
  0x6e   :  { %1090 = dma.done.wait [#allocation4 + $0x3], 16 }
  0x6f   :  { %1091 = vsyncadd [#allocation4 + $0x3], 4294967280 }
  0x70   :  { %1092 = dma.done.wait [#allocation4 + $0x4], 16 }
  0x71   :  { %1093 = vsyncadd [#allocation4 + $0x4], 4294967280 }
  0x72   :  { %1094 = dma.done.wait [#allocation4 + $0x5], 16 }
  0x73   :  { %1095 = vsyncadd [#allocation4 + $0x5], 4294967280 }
  0x74   :  { %1096 = dma.done.wait [#allocation4 + $0x6], 16 }
  0x75   :  { %1097 = vsyncadd [#allocation4 + $0x6], 4294967280 }
  0x76   :  { %1098 = dma.done.wait [#allocation4 + $0x7], 16 }
  0x77   :  { %1099 = vsyncadd [#allocation4 + $0x7], 4294967280 }
  0x78   :  { %1100 = dma.done.wait [#allocation4 + $0x8], 16 }
  0x79   :  { %1101 = vsyncadd [#allocation4 + $0x8], 4294967280 }
  0x7a   :  { %1102 = dma.done.wait [#allocation4 + $0x9], 16 }
  0x7b   :  { %1103 = vsyncadd [#allocation4 + $0x9], 4294967280 }
  0x7c   :  { %1104 = dma.done.wait [#allocation4 + $0xa], 16 }
  0x7d   :  { %1105 = vsyncadd [#allocation4 + $0xa], 4294967280 }
  0x7e   :  { %1106 = dma.done.wait [#allocation4 + $0xb], 16 }
  0x7f   :  { %1107 = vsyncadd [#allocation4 + $0xb], 4294967280 }
  0x80   :  { %1108 = dma.done.wait [#allocation4 + $0xc], 16 }
  0x81   :  { %1109 = vsyncadd [#allocation4 + $0xc], 4294967280 }
  0x82   :  { %1110 = dma.done.wait [#allocation4 + $0xd], 16 }
  0x83   :  { %1111 = vsyncadd [#allocation4 + $0xd], 4294967280 }
  0x84   :  { %1112 = dma.done.wait [#allocation4 + $0xe], 16 }
  0x85   :  { %1113 = vsyncadd [#allocation4 + $0xe], 4294967280 }
  0x86   :  { %1114 = dma.done.wait [#allocation4 + $0xf], 16 }
  0x87   :  { %1115 = vsyncadd [#allocation4 + $0xf], 4294967280  ;;  %v682_v16 = vld [vmem:[%s1260_s4 + $0x38] sm:$0xff]  ;;  %v681_v18 = vld [vmem:[%s1260_s4 + $0x30] sm:$0xff]  ;;  %vm683_vm0 = vcmask 261120   ;;  %vm750_vm1 = vcmask 80896   ;;  %v767_v56 = vlaneseq }
  0x88   :  { %v678_v17 = vld [vmem:[%s1260_s4 + $0x18] sm:$0xff]  ;;  %699 = vmatpush.msra.mxu0 %v682_v16  ;;  %v677_v19 = vld [vmem:[%s1260_s4 + $0x10] sm:$0xff]  ;;  %v680_v20 = vld [vmem:[%s1260_s4 + $0x28] sm:$0xff]  ;;  %v1120_v39 = vmov 0   ;;  %vm759_vm2 = vcmask 7168   ;;  %s793_s23 = sshll.u32 %s1264_s8, 4  ;;  %s794_s23 = int_to_ptr.hbm [resolvable:$true] %s793_s23 }
  0x89   :  { %722 = vmatpush.msra.mxu1 %v678_v17  ;;  %v676_v21 = vld [vmem:[%s1260_s4 + $0x8] sm:$0xff]  ;;  %v673_v22 = vld [vmem:[#allocation2] sm:$0xff]  ;;  %1030 = vset.pattern.permute.xlu2 %v1120_v39  ;;  %v768_v57 = vand.u32 127, %v767_v56 }
  0x8a   :  { %700 = vmatpush.msra.mxu0 %v681_v18  ;;  %v1032_v23 = vld [vmem:[%s1261_s5] ss:$0 sm:$0xff]  ;;  %v730_v26 = vmul.f32 %v673_v22, %v673_v22  ;;  %v674_v27 = vld [vmem:[#allocation3] sm:$0xff]  ;;  %1029 = vset.pattern.permute.xlu1 %v1120_v39 }
  0x8b   :  { %723 = vmatpush.msra.mxu1 %v677_v19  ;;  %v679_v24 = vld [vmem:[%s1260_s4 + $0x20] sm:$0xff]  ;;  %v739_v28 = vmul.f32 %v674_v27, %v674_v27  ;;  %1031 = vset.pattern.permute.xlu0 %v1120_v39  ;;  %vm771_vm3 = vcmp.eq.s32.totalorder %v768_v57, 2  ;;  %vm770_vm4 = vcmp.eq.s32.totalorder %v768_v57, 1  ;;  %vm769_vm5 = vcmp.eq.s32.totalorder %v768_v57, 0 }
  0x8c   :  { %v675_v25 = vld [vmem:[%s1260_s4] sm:$0xff]  ;;  %701 = vmatpush.msra.mxu0 %v680_v20  ;;  %v735_v29 = vmul.f32 %v1032_v23, %v730_v26 }
  0x8d   :  { %724 = vmatpush.msra.mxu1 %v676_v21  ;;  %v1033_v30 = vld [vmem:[%s1262_s6] ss:$0 sm:$0xff]  ;;  %s1121_s6 = smov [#allocation8]  }
  0x8e   :  { %702 = vmatpush.msra.mxu0 %v679_v24  ;;  %v736_v31 = vsel %vm683_vm0, %v735_v29, 0.0  ;;  %v744_v32 = vmul.f32 %v1033_v30, %v739_v28  ;;  %v756_v45 = vld [vmem:[%s1263_s7] sm:$0xff]  ;;  %s791_s21 = sshll.u32 %s1121_s6, 4  ;;  %s792_s21 = int_to_ptr.vmem [resolvable:$true] %s791_s21 }
  0x8f   :  { %725 = vmatpush.msra.mxu1 %v675_v25  ;;  %1007 = vmatmul.msk.f32.vlgmr.msra.gmra.mxu0 %vm683_vm0, %v674_v27 }
  0x90   :  { %1008 = vmatmul.msk.f32.vlgmr.msra.gmra.mxu1 %vm683_vm0, %v673_v22  ;;  %737 = vadd.xlane.f32.xlu0 %v736_v31  ;;  %v745_v33 = vsel %vm683_vm0, %v744_v32, 0.0 }
  0x98   :  { %746 = vadd.xlane.f32.xlu0 %v745_v33 }
 0x103   :  { %v738_v40 = vpop.xlane.xlu0 %737 }
 0x10b   :  { %v747_v41 = vpop.xlane.xlu0 %746 }
 0x10c   :  { %v704_v34 = vpop.f32.mrf.mxu0  ;;  %v748_v42 = vadd.f32 %v747_v41, %v738_v40 }
 0x10d   :  { %v727_v35 = vpop.f32.mrf.mxu1 }
 0x10e   :  { %v728_v36 = vadd.f32 %v727_v35, %v704_v34 }
 0x110   :  { %v749_v37 = vmul.f32 %v728_v36, %v728_v36 }
 0x112   :  { %v751_v38 = vsel %vm750_vm1, %v749_v37, 0.0 }
 0x113   :  { %752 = vadd.xlane.f32.xlu1 %v751_v38 }
 0x186   :  { %v753_v43 = vpop.xlane.xlu1 %752 }
 0x187   :  { %v754_v44 = vsub.f32 %v753_v43, %v748_v42 }
 0x189   :  { %v755_v46 = vmul.f32 0.5, %v754_v44 }
 0x18b   :  { %v757_v47 = vsub.f32 %v755_v46, %v756_v45 }
 0x18d   :  { %v758_v48 = vmul.f32 %v757_v47, %v757_v47 }
 0x18f   :  { %780 = vperm.xlu2 %1030, %v758_v48   ;;  %v760_v49 = vsel %vm759_vm2, %v758_v48, 0.0 }
 0x190   :  { %v761_v50 = vrot.slane %v760_v49, 4 }
 0x192   :  { %v762_v51 = vadd.f32 %v761_v50, %v760_v49 }
 0x194   :  { %v763_v52 = vrot.slane %v762_v51, 2 }
 0x196   :  { %v764_v53 = vadd.f32 %v763_v52, %v762_v51 }
 0x198   :  { %v765_v54 = vrot.slane %v764_v53, 1 }
 0x19a   :  { %v766_v55 = vadd.f32 %v765_v54, %v764_v53 }
 0x19c   :  { %774 = vperm.xlu1 %1029, %v766_v55  }
 0x1e9   :  { %v781_v59 = vpop.permute.xlu2 %780 }
 0x20e   :  { %v775_v58 = vpop.permute.xlu1 %774 }
 0x20f   :  { %v777_v60 = vsel %vm771_vm3, %v775_v58, 0.0 }
 0x210   :  { %v783_v61 = vsel %vm770_vm4, %v781_v59, %v777_v60 }
 0x211   :  { %v784_v62 = vsel %vm769_vm5, %v755_v46, %v783_v61 }
 0x212   :  { %785 = vst [vmem:[#allocation8] sm:$0xff] %v784_v62 }
 0x213   :  { %796 = dma.vmem_to_hbm [thread:$0]  %s792_s21, 128, %s794_s23, [#allocation9]  }
 0x214   :  { %1116 = dma.done.wait [#allocation9], 128  }
 0x215   :  { %1117 = vsyncadd [#allocation9], 4294967168 }
 0x216   :  { %801 = vsyncpa [#allocation9], 1 }
 0x217   :  { %802 = vsyncmov [#allocation4] }
 0x21a   :  { %s803_s24 = vpop.sfrf %802 }
 0x21b   :  { %p1009_p0 = scmp.ne.s32.totalorder %s803_s24, 0 }
 0x21d   :  { %807 = shalt.err (%p1009_p0)  }
 0x21e   :  { %809 = vsyncmov [#allocation4 + $0x1] }
 0x221   :  { %s810_s25 = vpop.sfrf %809 }
 0x222   :  { %p1010_p1 = scmp.ne.s32.totalorder %s810_s25, 0 }
 0x224   :  { %814 = shalt.err (%p1010_p1)  }
 0x225   :  { %816 = vsyncmov [#allocation4 + $0x2] }
 0x228   :  { %s817_s8 = vpop.sfrf %816 }
 0x229   :  { %p1011_p2 = scmp.ne.s32.totalorder %s817_s8, 0 }
 0x22b   :  { %821 = shalt.err (%p1011_p2)  }
 0x22c   :  { %823 = vsyncmov [#allocation4 + $0x3] }
 0x22f   :  { %s824_s26 = vpop.sfrf %823 }
 0x230   :  { %p1012_p3 = scmp.ne.s32.totalorder %s824_s26, 0 }
 0x232   :  { %828 = shalt.err (%p1012_p3)  }
 0x233   :  { %830 = vsyncmov [#allocation4 + $0x4] }
 0x236   :  { %s831_s2 = vpop.sfrf %830 }
 0x237   :  { %p1013_p4 = scmp.ne.s32.totalorder %s831_s2, 0 }
 0x239   :  { %835 = shalt.err (%p1013_p4)  }
 0x23a   :  { %837 = vsyncmov [#allocation4 + $0x5] }
 0x23d   :  { %s838_s3 = vpop.sfrf %837 }
 0x23e   :  { %p1014_p5 = scmp.ne.s32.totalorder %s838_s3, 0 }
 0x240   :  { %842 = shalt.err (%p1014_p5)  }
 0x241   :  { %844 = vsyncmov [#allocation4 + $0x6] }
 0x244   :  { %s845_s27 = vpop.sfrf %844 }
 0x245   :  { %p1015_p6 = scmp.ne.s32.totalorder %s845_s27, 0 }
 0x247   :  { %849 = shalt.err (%p1015_p6)  }
 0x248   :  { %851 = vsyncmov [#allocation4 + $0x7] }
 0x24b   :  { %s852_s28 = vpop.sfrf %851 }
 0x24c   :  { %p1016_p7 = scmp.ne.s32.totalorder %s852_s28, 0 }
 0x24e   :  { %856 = shalt.err (%p1016_p7)  }
 0x24f   :  { %858 = vsyncmov [#allocation4 + $0x8] }
 0x252   :  { %s859_s29 = vpop.sfrf %858 }
 0x253   :  { %p1017_p8 = scmp.ne.s32.totalorder %s859_s29, 0 }
 0x255   :  { %863 = shalt.err (%p1017_p8)  }
 0x256   :  { %865 = vsyncmov [#allocation4 + $0x9] }
 0x259   :  { %s866_s30 = vpop.sfrf %865 }
 0x25a   :  { %p1018_p9 = scmp.ne.s32.totalorder %s866_s30, 0 }
 0x25c   :  { %870 = shalt.err (%p1018_p9)  }
 0x25d   :  { %872 = vsyncmov [#allocation4 + $0xa] }
 0x260   :  { %s873_s9 = vpop.sfrf %872 }
 0x261   :  { %p1019_p10 = scmp.ne.s32.totalorder %s873_s9, 0 }
 0x263   :  { %877 = shalt.err (%p1019_p10)  }
 0x264   :  { %879 = vsyncmov [#allocation4 + $0xb] }
 0x267   :  { %s880_s10 = vpop.sfrf %879 }
 0x268   :  { %p1020_p11 = scmp.ne.s32.totalorder %s880_s10, 0 }
 0x26a   :  { %884 = shalt.err (%p1020_p11)  }
 0x26b   :  { %886 = vsyncmov [#allocation4 + $0xc] }
 0x26e   :  { %s887_s11 = vpop.sfrf %886 }
 0x26f   :  { %p1021_p12 = scmp.ne.s32.totalorder %s887_s11, 0 }
 0x271   :  { %891 = shalt.err (%p1021_p12)  }
 0x272   :  { %893 = vsyncmov [#allocation4 + $0xd] }
 0x275   :  { %s894_s12 = vpop.sfrf %893 }
 0x276   :  { %p1022_p13 = scmp.ne.s32.totalorder %s894_s12, 0 }
 0x278   :  { %898 = shalt.err (%p1022_p13)  }
 0x279   :  { %900 = vsyncmov [#allocation4 + $0xe] }
 0x27c   :  { %s901_s13 = vpop.sfrf %900 }
 0x27d   :  { %p1023_p0 = scmp.ne.s32.totalorder %s901_s13, 0 }
 0x27f   :  { %905 = shalt.err (%p1023_p0)  }
 0x280   :  { %907 = vsyncmov [#allocation4 + $0xf] }
 0x283   :  { %s908_s14 = vpop.sfrf %907 }
 0x284   :  { %p1024_p1 = scmp.ne.s32.totalorder %s908_s14, 0 }
 0x286   :  { %912 = shalt.err (%p1024_p1)  }

</bundles_post_ra>
